<compile_context>
chip_gen: v6e
topology: v6e:2x2x1
jax: 0.10.0
libtpu: 0.0.40
codegen_flags: <defaults>
</compile_context>

<pallas_src>
import math
from functools import partial

import numpy as np
import jax
import jax.numpy as jnp
from jax.experimental import pallas as pl
from jax.experimental.pallas import tpu as pltpu


# ----------------------------------------------------------------------------
# Pallas kernel: whole forward pass in one invocation (gridless; everything
# fits trivially in VMEM at these sizes).
# ----------------------------------------------------------------------------
def attention_iql_kernel(hist_ref, curr_ref, p_ref, out_ref,
                         *, lo, T, d_hist, d_curr, D, H):
    eps = 1e-5
    W2 = 2 * D

    def layernorm(x, g, b):
        mu = jnp.mean(x, axis=-1, keepdims=True)
        xc = x - mu
        var = jnp.mean(xc * xc, axis=-1, keepdims=True)
        return xc * jax.lax.rsqrt(var + eps) * g + b

    # --- time encoding -------------------------------------------------------
    pe = p_ref[lo["pe"]:lo["pe"] + T, 0:d_hist]                   # [T, d_hist]
    hist_enc = hist_ref[...] + pe                                 # [T, d_hist]

    # --- Q / (K|V) projections (no bias), K and V fused into one matmul ------
    wq = p_ref[lo["wq"]:lo["wq"] + d_curr, 0:D]                   # [d_curr, D]
    wkv = p_ref[lo["wkv"]:lo["wkv"] + d_hist, 0:W2]               # [d_hist, 2D]
    Q = jnp.dot(curr_ref[...], wq, preferred_element_type=jnp.float32)   # [1, D]
    KV = jnp.dot(hist_enc, wkv, preferred_element_type=jnp.float32)      # [T, 2D]

    g1 = p_ref[lo["vec"] + 0:lo["vec"] + 1, 0:D]
    b1 = p_ref[lo["vec"] + 1:lo["vec"] + 2, 0:D]
    Qn = layernorm(Q, g1, b1)
    Kn = layernorm(KV[:, :D], g1, b1)
    Vn = layernorm(KV[:, D:], g1, b1)
    KVn = jnp.concatenate([Kn, Vn], axis=1)                       # [T, 2D]

    # --- MHA in-projection: q (scale pre-folded), k|v fused via block-diag ---
    wiq = p_ref[lo["wiq"]:lo["wiq"] + D, 0:D]                     # pre-scaled
    biq = p_ref[lo["vec"] + 2:lo["vec"] + 3, 0:D]                 # pre-scaled
    wbd = p_ref[lo["wbd"]:lo["wbd"] + W2, 0:W2]                   # blockdiag(wik, wiv)
    bkv = p_ref[lo["vec"] + 3:lo["vec"] + 4, 0:W2]

    q = jnp.dot(Qn, wiq, preferred_element_type=jnp.float32) + biq        # [1, D]
    kv = jnp.dot(KVn, wbd, preferred_element_type=jnp.float32) + bkv      # [T, 2D]
    k = kv[:, :D]
    v = kv[:, D:]

    # --- per-head scores via head-mask matmul (avoids 3-D reshapes) ----------
    mask = p_ref[lo["mask"]:lo["mask"] + D, 0:H]                  # [D, H]
    mask_t = p_ref[lo["mask_t"]:lo["mask_t"] + H, 0:D]            # [H, D]

    prod = k * q                                                  # [T, D]
    scores = jnp.dot(prod, mask, preferred_element_type=jnp.float32)      # [T, H]

    # softmax over keys (axis 0), per head
    m = jnp.max(scores, axis=0, keepdims=True)
    e = jnp.exp(scores - m)
    s = jnp.sum(e, axis=0, keepdims=True)
    w = e * pl.reciprocal(s, approx=False)                        # [T, H]

    # expand head weights back to feature dim and reduce over keys
    w_exp = jnp.dot(w, mask_t, preferred_element_type=jnp.float32)        # [T, D]
    attn = jnp.sum(w_exp * v, axis=0, keepdims=True)              # [1, D]

    # --- output projection ----------------------------------------------------
    wo = p_ref[lo["wo"]:lo["wo"] + D, 0:D]
    bo = p_ref[lo["vec"] + 4:lo["vec"] + 5, 0:D]
    attn = jnp.dot(attn, wo, preferred_element_type=jnp.float32) + bo

    # --- norm2 + MLP(ReLU, Linear(D -> 1)) -------------------------------------
    g2 = p_ref[lo["vec"] + 5:lo["vec"] + 6, 0:D]
    b2 = p_ref[lo["vec"] + 6:lo["vec"] + 7, 0:D]
    y = layernorm(attn, g2, b2)
    y = jnp.maximum(y, 0.0)
    wm = p_ref[lo["vec"] + 7:lo["vec"] + 8, 0:D]
    bm = p_ref[lo["vec"] + 8:lo["vec"] + 9, 0:1]                  # [1, 1]
    out_ref[...] = jnp.sum(y * wm, axis=-1, keepdims=True) + bm


# ----------------------------------------------------------------------------
# One-time host-side preparation: PE table, transposes, fused weights, packing
# into a single VMEM slab. Built once and cached by the caller.
# ----------------------------------------------------------------------------
def make_time_encoding_np(d_model, max_len=48):
    position = np.arange(max_len, dtype=np.float32)[:, None]
    div_term = np.exp(
        np.arange(0, d_model, 2, dtype=np.float32) * (-math.log(10000.0) / d_model)
    )
    pe = np.zeros((max_len, d_model), dtype=np.float32)
    pe[:, 0::2] = np.sin(position * div_term)
    if d_model % 2 == 1:
        pe[:, 1::2] = np.cos(position * div_term)[:, :-1]
    else:
        pe[:, 1::2] = np.cos(position * div_term)
    return pe


def _round_up(x, m):
    return ((x + m - 1) // m) * m


def prepare_packed_params(params, T, d_hist, d_curr, d_model, n_heads):
    """Pack every parameter into one f32 slab [R, 2*d_model]; returns (slab, rows)."""
    D, H = d_model, n_heads
    hd = D // H
    scale = 1.0 / math.sqrt(hd)
    W2 = 2 * D

    pe = make_time_encoding_np(d_hist, 48)[:T]                    # [T, d_hist]
    wq_t = np.asarray(params["wq"]).T                             # [d_curr, D]
    wkv_t = np.concatenate(
        [np.asarray(params["wk"]).T, np.asarray(params["wv"]).T], axis=1
    )                                                             # [d_hist, 2D]

    ipw = np.asarray(params["in_proj_w"])
    ipb = np.asarray(params["in_proj_b"])
    wiq_t = ipw[:D].T * scale                                     # scale folded
    biq = ipb[:D] * scale
    wbd = np.zeros((W2, W2), np.float32)                          # blockdiag(wik.T, wiv.T)
    wbd[:D, :D] = ipw[D:2 * D].T
    wbd[D:, D:] = ipw[2 * D:].T
    bkv = np.concatenate([ipb[D:2 * D], ipb[2 * D:]])             # [2D]

    wo_t = np.asarray(params["out_proj_w"]).T                     # [D, D]
    bo = np.asarray(params["out_proj_b"])                         # [D]

    head_ids = np.repeat(np.arange(H), hd)
    mask = (head_ids[:, None] == np.arange(H)[None, :]).astype(np.float32)  # [D, H]

    rows = {}
    off = 0

    def alloc(name, nrows):
        nonlocal off
        rows[name] = off
        off += _round_up(nrows, 8)

    alloc("pe", T)
    alloc("wq", d_curr)
    alloc("wkv", d_hist)
    alloc("wiq", D)
    alloc("wbd", W2)
    alloc("wo", D)
    alloc("mask", D)
    alloc("mask_t", H)
    alloc("vec", 9)
    total = off

    slab = np.zeros((total, W2), np.float32)
    slab[rows["pe"]:rows["pe"] + T, :d_hist] = pe
    slab[rows["wq"]:rows["wq"] + d_curr, :D] = wq_t
    slab[rows["wkv"]:rows["wkv"] + d_hist, :W2] = wkv_t
    slab[rows["wiq"]:rows["wiq"] + D, :D] = wiq_t
    slab[rows["wbd"]:rows["wbd"] + W2, :W2] = wbd
    slab[rows["wo"]:rows["wo"] + D, :D] = wo_t
    slab[rows["mask"]:rows["mask"] + D, :H] = mask
    slab[rows["mask_t"]:rows["mask_t"] + H, :D] = mask.T
    v0 = rows["vec"]
    slab[v0 + 0, :D] = np.asarray(params["n1_g"]).reshape(-1)
    slab[v0 + 1, :D] = np.asarray(params["n1_b"]).reshape(-1)
    slab[v0 + 2, :D] = biq
    slab[v0 + 3, :W2] = bkv
    slab[v0 + 4, :D] = bo
    slab[v0 + 5, :D] = np.asarray(params["n2_g"]).reshape(-1)
    slab[v0 + 6, :D] = np.asarray(params["n2_b"]).reshape(-1)
    slab[v0 + 7, :D] = np.asarray(params["mlp_w"]).reshape(-1)
    slab[v0 + 8, 0] = float(np.asarray(params["mlp_b"]).reshape(-1)[0])

    return jnp.asarray(slab), rows


def make_forward(rows, *, T, d_hist, d_curr, d_model, n_heads):
    """Builds the jitted forward callable; slab & layout are prepared once."""
    kernel = partial(
        attention_iql_kernel,
        lo=dict(rows), T=T, d_hist=d_hist, d_curr=d_curr, D=d_model, H=n_heads,
    )
    call = pl.pallas_call(
        kernel,
        out_shape=jax.ShapeDtypeStruct((1, 1), jnp.float32),
        in_specs=[pl.BlockSpec(memory_space=pltpu.MemorySpace.VMEM)] * 3,
        out_specs=pl.BlockSpec(memory_space=pltpu.MemorySpace.VMEM),
    )

    @jax.jit
    def fwd(hist2d, curr2d, slab):
        return call(hist2d.astype(jnp.float32), curr2d.astype(jnp.float32), slab)

    return fwd


# ----------------------------------------------------------------------------
# Parameter init (torch-like layouts, [out, in]).
# ----------------------------------------------------------------------------
def init_params(key, d_hist, d_curr, d_model, n_heads):
    ks = jax.random.split(key, 8)

    def kaiming(k, out_f, in_f):
        std = math.sqrt(2.0 / in_f)
        return jax.random.normal(k, (out_f, in_f), jnp.float32) * std

    return {
        "wq": kaiming(ks[0], d_model, d_curr),
        "wk": kaiming(ks[1], d_model, d_hist),
        "wv": kaiming(ks[2], d_model, d_hist),
        "n1_g": jnp.ones((1, d_model), jnp.float32),
        "n1_b": jnp.zeros((1, d_model), jnp.float32),
        "in_proj_w": jax.random.normal(ks[3], (3 * d_model, d_model), jnp.float32)
        * math.sqrt(1.0 / d_model),
        "in_proj_b": jnp.zeros((3 * d_model,), jnp.float32),
        "out_proj_w": jax.random.normal(ks[4], (d_model, d_model), jnp.float32)
        * math.sqrt(1.0 / d_model),
        "out_proj_b": jnp.zeros((d_model,), jnp.float32),
        "n2_g": jnp.ones((1, d_model), jnp.float32),
        "n2_b": jnp.zeros((1, d_model), jnp.float32),
        "mlp_w": kaiming(ks[5], 1, d_model),
        "mlp_b": jnp.zeros((1, 1), jnp.float32),
    }


# ----------------------------------------------------------------------------
# Pure-JAX reference (same math) for a correctness check.
# ----------------------------------------------------------------------------
def reference_forward(history, current, params, *, d_model, n_heads):
    T, _, d_hist = history.shape
    head_dim = d_model // n_heads
    eps = 1e-5

    def ln(x, g, b):
        mu = jnp.mean(x, axis=-1, keepdims=True)
        var = jnp.mean((x - mu) ** 2, axis=-1, keepdims=True)
        return (x - mu) / jnp.sqrt(var + eps) * g + b

    hist = history[:, 0, :] + jnp.asarray(make_time_encoding_np(d_hist, 48)[:T])
    curr = current[0]
    Q = curr @ params["wq"].T
    K = hist @ params["wk"].T
    V = hist @ params["wv"].T
    Q = ln(Q, params["n1_g"], params["n1_b"])
    K = ln(K, params["n1_g"], params["n1_b"])
    V = ln(V, params["n1_g"], params["n1_b"])
    ipw, ipb = params["in_proj_w"], params["in_proj_b"]
    q = Q @ ipw[:d_model].T + ipb[:d_model]
    k = K @ ipw[d_model:2 * d_model].T + ipb[d_model:2 * d_model]
    v = V @ ipw[2 * d_model:].T + ipb[2 * d_model:]
    qh = q.reshape(1, n_heads, head_dim)
    kh = k.reshape(T, n_heads, head_dim)
    vh = v.reshape(T, n_heads, head_dim)
    scores = jnp.einsum("qhd,khd->hqk", qh, kh) / math.sqrt(head_dim)
    w = jax.nn.softmax(scores, axis=-1)
    oh = jnp.einsum("hqk,khd->qhd", w, vh).reshape(1, d_model)
    attn = oh @ params["out_proj_w"].T + params["out_proj_b"]
    y = ln(attn, params["n2_g"], params["n2_b"])
    y = jnp.maximum(y, 0.0)
    return y @ params["mlp_w"].T + params["mlp_b"][0]             # [1, 1]


if __name__ == "__main__":
    T = 8          # history length
    d_hist = 16
    d_curr = 8
    d_model = 32
    n_heads = 8

    key = jax.random.PRNGKey(0)
    k_hist, k_curr, k_param = jax.random.split(key, 3)
    history = jax.random.normal(k_hist, (T, 1, d_hist), jnp.float32)
    current = jax.random.normal(k_curr, (1, 1, d_curr), jnp.float32)
    params = init_params(k_param, d_hist, d_curr, d_model, n_heads)

    # One-time packing of all parameters/constants into a single VMEM slab.
    slab, rows = prepare_packed_params(params, T, d_hist, d_curr, d_model, n_heads)
    fwd = make_forward(rows, T=T, d_hist=d_hist, d_curr=d_curr,
                       d_model=d_model, n_heads=n_heads)

    hist2d = history[:, 0, :]     # [T, d_hist]
    curr2d = current[0]           # [1, d_curr]
    out = fwd(hist2d, curr2d, slab)
    out = jax.block_until_ready(out)

    ref = reference_forward(history, current, params,
                            d_model=d_model, n_heads=n_heads)
    assert out.shape == (1, 1)
    np.testing.assert_allclose(np.asarray(out), np.asarray(ref),
                               rtol=1e-4, atol=1e-4)
    print("KERNEL_OK")
</pallas_src>

<mosaic_0001>
module attributes {stable_mosaic.version = 11 : i64} {
  func.func @attention_iql_kernel(%arg0: memref<8x16xf32, #tpu.memory_space<vmem>>, %arg1: memref<1x8xf32, #tpu.memory_space<vmem>>, %arg2: memref<216x64xf32, #tpu.memory_space<vmem>>, %arg3: memref<1x1xf32, #tpu.memory_space<vmem>>) attributes {dimension_semantics = [], scalar_prefetch = 0 : i64, scratch_operands = 0 : i64, tpu.core_type = #tpu.core_type<tc>} {
    %c0 = arith.constant 0 : index
    %c0_0 = arith.constant 0 : index
    %0 = vector.load %arg2[%c0, %c0_0] : memref<216x64xf32, #tpu.memory_space<vmem>>, vector<8x16xf32>
    %c0_1 = arith.constant 0 : index
    %c0_2 = arith.constant 0 : index
    %1 = vector.load %arg0[%c0_1, %c0_2] : memref<8x16xf32, #tpu.memory_space<vmem>>, vector<8x16xf32>
    %2 = arith.addf %1, %0 : vector<8x16xf32>
    %c8 = arith.constant 8 : index
    %c0_3 = arith.constant 0 : index
    %3 = vector.load %arg2[%c8, %c0_3] : memref<216x64xf32, #tpu.memory_space<vmem>>, vector<8x32xf32>
    %c16 = arith.constant 16 : index
    %c0_4 = arith.constant 0 : index
    %4 = vector.load %arg2[%c16, %c0_4] : memref<216x64xf32, #tpu.memory_space<vmem>>, vector<16x64xf32>
    %c0_5 = arith.constant 0 : index
    %c0_6 = arith.constant 0 : index
    %5 = vector.load %arg1[%c0_5, %c0_6] : memref<1x8xf32, #tpu.memory_space<vmem>>, vector<1x8xf32>
    %cst = arith.constant dense<0.000000e+00> : vector<1x32xf32>
    %6 = tpu.matmul %5, %3, %cst {dimension_numbers = #tpu.dot_dimension_numbers<[1], [0], [0], [1], [0, 0, 1, 1], [], []>} : vector<1x8xf32>, vector<8x32xf32>, vector<1x32xf32> -> vector<1x32xf32>
    %cst_7 = arith.constant dense<0.000000e+00> : vector<8x64xf32>
    %7 = tpu.matmul %2, %4, %cst_7 {dimension_numbers = #tpu.dot_dimension_numbers<[1], [0], [0], [1], [0, 0, 1, 1], [], []>} : vector<8x16xf32>, vector<16x64xf32>, vector<8x64xf32> -> vector<8x64xf32>
    %c200 = arith.constant 200 : index
    %c0_8 = arith.constant 0 : index
    %8 = vector.load %arg2[%c200, %c0_8] : memref<216x64xf32, #tpu.memory_space<vmem>>, vector<1x32xf32>
    %c201 = arith.constant 201 : index
    %c0_9 = arith.constant 0 : index
    %9 = vector.load %arg2[%c201, %c0_9] : memref<216x64xf32, #tpu.memory_space<vmem>>, vector<1x32xf32>
    %cst_10 = arith.constant dense<0.000000e+00> : vector<1xf32>
    %10 = vector.multi_reduction <add>, %6, %cst_10 [1] : vector<1x32xf32> to vector<1xf32>
    %11 = vector.shape_cast %10 : vector<1xf32> to vector<1x1xf32>
    %cst_11 = arith.constant 3.200000e+01 : f32
    %12 = vector.broadcast %cst_11 : f32 to vector<1x1xf32>
    %13 = arith.divf %11, %12 : vector<1x1xf32>
    %14 = vector.broadcast %13 : vector<1x1xf32> to vector<1x32xf32>
    %15 = arith.subf %6, %14 : vector<1x32xf32>
    %16 = arith.mulf %15, %15 : vector<1x32xf32>
    %cst_12 = arith.constant dense<0.000000e+00> : vector<1xf32>
    %17 = vector.multi_reduction <add>, %16, %cst_12 [1] : vector<1x32xf32> to vector<1xf32>
    %18 = vector.shape_cast %17 : vector<1xf32> to vector<1x1xf32>
    %cst_13 = arith.constant 3.200000e+01 : f32
    %19 = vector.broadcast %cst_13 : f32 to vector<1x1xf32>
    %20 = arith.divf %18, %19 : vector<1x1xf32>
    %cst_14 = arith.constant 9.99999974E-6 : f32
    %21 = vector.broadcast %cst_14 : f32 to vector<1x1xf32>
    %22 = arith.addf %20, %21 : vector<1x1xf32>
    %23 = math.rsqrt %22 : vector<1x1xf32>
    %24 = vector.broadcast %23 : vector<1x1xf32> to vector<1x32xf32>
    %25 = arith.mulf %15, %24 : vector<1x32xf32>
    %26 = arith.mulf %25, %8 : vector<1x32xf32>
    %27 = arith.addf %26, %9 : vector<1x32xf32>
    %28 = vector.extract_strided_slice %7 {offsets = [0, 0], sizes = [8, 32], strides = [1, 1]} : vector<8x64xf32> to vector<8x32xf32>
    %cst_15 = arith.constant dense<0.000000e+00> : vector<8xf32>
    %29 = vector.multi_reduction <add>, %28, %cst_15 [1] : vector<8x32xf32> to vector<8xf32>
    %30 = vector.shape_cast %29 : vector<8xf32> to vector<8x1xf32>
    %cst_16 = arith.constant 3.200000e+01 : f32
    %31 = vector.broadcast %cst_16 : f32 to vector<8x1xf32>
    %32 = arith.divf %30, %31 : vector<8x1xf32>
    %33 = vector.broadcast %32 : vector<8x1xf32> to vector<8x32xf32>
    %34 = arith.subf %28, %33 : vector<8x32xf32>
    %35 = arith.mulf %34, %34 : vector<8x32xf32>
    %cst_17 = arith.constant dense<0.000000e+00> : vector<8xf32>
    %36 = vector.multi_reduction <add>, %35, %cst_17 [1] : vector<8x32xf32> to vector<8xf32>
    %37 = vector.shape_cast %36 : vector<8xf32> to vector<8x1xf32>
    %cst_18 = arith.constant 3.200000e+01 : f32
    %38 = vector.broadcast %cst_18 : f32 to vector<8x1xf32>
    %39 = arith.divf %37, %38 : vector<8x1xf32>
    %cst_19 = arith.constant 9.99999974E-6 : f32
    %40 = vector.broadcast %cst_19 : f32 to vector<8x1xf32>
    %41 = arith.addf %39, %40 : vector<8x1xf32>
    %42 = math.rsqrt %41 : vector<8x1xf32>
    %43 = vector.broadcast %42 : vector<8x1xf32> to vector<8x32xf32>
    %44 = arith.mulf %34, %43 : vector<8x32xf32>
    %45 = vector.broadcast %8 : vector<1x32xf32> to vector<8x32xf32>
    %46 = arith.mulf %44, %45 : vector<8x32xf32>
    %47 = vector.broadcast %9 : vector<1x32xf32> to vector<8x32xf32>
    %48 = arith.addf %46, %47 : vector<8x32xf32>
    %49 = vector.extract_strided_slice %7 {offsets = [0, 32], sizes = [8, 32], strides = [1, 1]} : vector<8x64xf32> to vector<8x32xf32>
    %cst_20 = arith.constant dense<0.000000e+00> : vector<8xf32>
    %50 = vector.multi_reduction <add>, %49, %cst_20 [1] : vector<8x32xf32> to vector<8xf32>
    %51 = vector.shape_cast %50 : vector<8xf32> to vector<8x1xf32>
    %cst_21 = arith.constant 3.200000e+01 : f32
    %52 = vector.broadcast %cst_21 : f32 to vector<8x1xf32>
    %53 = arith.divf %51, %52 : vector<8x1xf32>
    %54 = vector.broadcast %53 : vector<8x1xf32> to vector<8x32xf32>
    %55 = arith.subf %49, %54 : vector<8x32xf32>
    %56 = arith.mulf %55, %55 : vector<8x32xf32>
    %cst_22 = arith.constant dense<0.000000e+00> : vector<8xf32>
    %57 = vector.multi_reduction <add>, %56, %cst_22 [1] : vector<8x32xf32> to vector<8xf32>
    %58 = vector.shape_cast %57 : vector<8xf32> to vector<8x1xf32>
    %cst_23 = arith.constant 3.200000e+01 : f32
    %59 = vector.broadcast %cst_23 : f32 to vector<8x1xf32>
    %60 = arith.divf %58, %59 : vector<8x1xf32>
    %cst_24 = arith.constant 9.99999974E-6 : f32
    %61 = vector.broadcast %cst_24 : f32 to vector<8x1xf32>
    %62 = arith.addf %60, %61 : vector<8x1xf32>
    %63 = math.rsqrt %62 : vector<8x1xf32>
    %64 = vector.broadcast %63 : vector<8x1xf32> to vector<8x32xf32>
    %65 = arith.mulf %55, %64 : vector<8x32xf32>
    %66 = vector.broadcast %8 : vector<1x32xf32> to vector<8x32xf32>
    %67 = arith.mulf %65, %66 : vector<8x32xf32>
    %68 = vector.broadcast %9 : vector<1x32xf32> to vector<8x32xf32>
    %69 = arith.addf %67, %68 : vector<8x32xf32>
    %70 = tpu.concatenate %48, %69 in 1 : vector<8x32xf32>, vector<8x32xf32> -> vector<8x64xf32>
    %c32 = arith.constant 32 : index
    %c0_25 = arith.constant 0 : index
    %71 = vector.load %arg2[%c32, %c0_25] : memref<216x64xf32, #tpu.memory_space<vmem>>, vector<32x32xf32>
    %c202 = arith.constant 202 : index
    %c0_26 = arith.constant 0 : index
    %72 = vector.load %arg2[%c202, %c0_26] : memref<216x64xf32, #tpu.memory_space<vmem>>, vector<1x32xf32>
    %c64 = arith.constant 64 : index
    %c0_27 = arith.constant 0 : index
    %73 = vector.load %arg2[%c64, %c0_27] : memref<216x64xf32, #tpu.memory_space<vmem>>, vector<64x64xf32>
    %c203 = arith.constant 203 : index
    %c0_28 = arith.constant 0 : index
    %74 = vector.load %arg2[%c203, %c0_28] : memref<216x64xf32, #tpu.memory_space<vmem>>, vector<1x64xf32>
    %cst_29 = arith.constant dense<0.000000e+00> : vector<1x32xf32>
    %75 = tpu.matmul %27, %71, %cst_29 {dimension_numbers = #tpu.dot_dimension_numbers<[1], [0], [0], [1], [0, 0, 1, 1], [], []>} : vector<1x32xf32>, vector<32x32xf32>, vector<1x32xf32> -> vector<1x32xf32>
    %76 = arith.addf %75, %72 : vector<1x32xf32>
    %cst_30 = arith.constant dense<0.000000e+00> : vector<8x64xf32>
    %77 = tpu.matmul %70, %73, %cst_30 {dimension_numbers = #tpu.dot_dimension_numbers<[1], [0], [0], [1], [0, 0, 1, 1], [], []>} : vector<8x64xf32>, vector<64x64xf32>, vector<8x64xf32> -> vector<8x64xf32>
    %78 = vector.broadcast %74 : vector<1x64xf32> to vector<8x64xf32>
    %79 = arith.addf %77, %78 : vector<8x64xf32>
    %80 = vector.extract_strided_slice %79 {offsets = [0, 0], sizes = [8, 32], strides = [1, 1]} : vector<8x64xf32> to vector<8x32xf32>
    %81 = vector.extract_strided_slice %79 {offsets = [0, 32], sizes = [8, 32], strides = [1, 1]} : vector<8x64xf32> to vector<8x32xf32>
    %c160 = arith.constant 160 : index
    %c0_31 = arith.constant 0 : index
    %82 = vector.load %arg2[%c160, %c0_31] : memref<216x64xf32, #tpu.memory_space<vmem>>, vector<32x8xf32>
    %c192 = arith.constant 192 : index
    %c0_32 = arith.constant 0 : index
    %83 = vector.load %arg2[%c192, %c0_32] : memref<216x64xf32, #tpu.memory_space<vmem>>, vector<8x32xf32>
    %84 = vector.broadcast %76 : vector<1x32xf32> to vector<8x32xf32>
    %85 = arith.mulf %80, %84 : vector<8x32xf32>
    %cst_33 = arith.constant dense<0.000000e+00> : vector<8x8xf32>
    %86 = tpu.matmul %85, %82, %cst_33 {dimension_numbers = #tpu.dot_dimension_numbers<[1], [0], [0], [1], [0, 0, 1, 1], [], []>} : vector<8x32xf32>, vector<32x8xf32>, vector<8x8xf32> -> vector<8x8xf32>
    %cst_34 = arith.constant dense<0xFF800000> : vector<8xf32>
    %87 = vector.multi_reduction <maximumf>, %86, %cst_34 [0] : vector<8x8xf32> to vector<8xf32>
    %88 = vector.shape_cast %87 : vector<8xf32> to vector<1x8xf32>
    %89 = vector.broadcast %88 : vector<1x8xf32> to vector<8x8xf32>
    %90 = arith.subf %86, %89 : vector<8x8xf32>
    %91 = math.exp %90 : vector<8x8xf32>
    %cst_35 = arith.constant dense<0.000000e+00> : vector<8xf32>
    %92 = vector.multi_reduction <add>, %91, %cst_35 [0] : vector<8x8xf32> to vector<8xf32>
    %93 = vector.shape_cast %92 : vector<8xf32> to vector<1x8xf32>
    %94 = tpu.reciprocal %93 : vector<1x8xf32> -> vector<1x8xf32>
    %95 = vector.broadcast %94 : vector<1x8xf32> to vector<8x8xf32>
    %96 = arith.mulf %91, %95 : vector<8x8xf32>
    %cst_36 = arith.constant dense<0.000000e+00> : vector<8x32xf32>
    %97 = tpu.matmul %96, %83, %cst_36 {dimension_numbers = #tpu.dot_dimension_numbers<[1], [0], [0], [1], [0, 0, 1, 1], [], []>} : vector<8x8xf32>, vector<8x32xf32>, vector<8x32xf32> -> vector<8x32xf32>
    %98 = arith.mulf %97, %81 : vector<8x32xf32>
    %cst_37 = arith.constant dense<0.000000e+00> : vector<32xf32>
    %99 = vector.multi_reduction <add>, %98, %cst_37 [0] : vector<8x32xf32> to vector<32xf32>
    %100 = vector.shape_cast %99 : vector<32xf32> to vector<1x32xf32>
    %c128 = arith.constant 128 : index
    %c0_38 = arith.constant 0 : index
    %101 = vector.load %arg2[%c128, %c0_38] : memref<216x64xf32, #tpu.memory_space<vmem>>, vector<32x32xf32>
    %c204 = arith.constant 204 : index
    %c0_39 = arith.constant 0 : index
    %102 = vector.load %arg2[%c204, %c0_39] : memref<216x64xf32, #tpu.memory_space<vmem>>, vector<1x32xf32>
    %cst_40 = arith.constant dense<0.000000e+00> : vector<1x32xf32>
    %103 = tpu.matmul %100, %101, %cst_40 {dimension_numbers = #tpu.dot_dimension_numbers<[1], [0], [0], [1], [0, 0, 1, 1], [], []>} : vector<1x32xf32>, vector<32x32xf32>, vector<1x32xf32> -> vector<1x32xf32>
    %104 = arith.addf %103, %102 : vector<1x32xf32>
    %c205 = arith.constant 205 : index
    %c0_41 = arith.constant 0 : index
    %105 = vector.load %arg2[%c205, %c0_41] : memref<216x64xf32, #tpu.memory_space<vmem>>, vector<1x32xf32>
    %c206 = arith.constant 206 : index
    %c0_42 = arith.constant 0 : index
    %106 = vector.load %arg2[%c206, %c0_42] : memref<216x64xf32, #tpu.memory_space<vmem>>, vector<1x32xf32>
    %cst_43 = arith.constant dense<0.000000e+00> : vector<1xf32>
    %107 = vector.multi_reduction <add>, %104, %cst_43 [1] : vector<1x32xf32> to vector<1xf32>
    %108 = vector.shape_cast %107 : vector<1xf32> to vector<1x1xf32>
    %cst_44 = arith.constant 3.200000e+01 : f32
    %109 = vector.broadcast %cst_44 : f32 to vector<1x1xf32>
    %110 = arith.divf %108, %109 : vector<1x1xf32>
    %111 = vector.broadcast %110 : vector<1x1xf32> to vector<1x32xf32>
    %112 = arith.subf %104, %111 : vector<1x32xf32>
    %113 = arith.mulf %112, %112 : vector<1x32xf32>
    %cst_45 = arith.constant dense<0.000000e+00> : vector<1xf32>
    %114 = vector.multi_reduction <add>, %113, %cst_45 [1] : vector<1x32xf32> to vector<1xf32>
    %115 = vector.shape_cast %114 : vector<1xf32> to vector<1x1xf32>
    %cst_46 = arith.constant 3.200000e+01 : f32
    %116 = vector.broadcast %cst_46 : f32 to vector<1x1xf32>
    %117 = arith.divf %115, %116 : vector<1x1xf32>
    %cst_47 = arith.constant 9.99999974E-6 : f32
    %118 = vector.broadcast %cst_47 : f32 to vector<1x1xf32>
    %119 = arith.addf %117, %118 : vector<1x1xf32>
    %120 = math.rsqrt %119 : vector<1x1xf32>
    %121 = vector.broadcast %120 : vector<1x1xf32> to vector<1x32xf32>
    %122 = arith.mulf %112, %121 : vector<1x32xf32>
    %123 = arith.mulf %122, %105 : vector<1x32xf32>
    %124 = arith.addf %123, %106 : vector<1x32xf32>
    %cst_48 = arith.constant 0.000000e+00 : f32
    %125 = vector.broadcast %cst_48 : f32 to vector<1x32xf32>
    %126 = arith.maximumf %124, %125 : vector<1x32xf32>
    %c207 = arith.constant 207 : index
    %c0_49 = arith.constant 0 : index
    %127 = vector.load %arg2[%c207, %c0_49] : memref<216x64xf32, #tpu.memory_space<vmem>>, vector<1x32xf32>
    %c208 = arith.constant 208 : index
    %c0_50 = arith.constant 0 : index
    %128 = vector.load %arg2[%c208, %c0_50] : memref<216x64xf32, #tpu.memory_space<vmem>>, vector<1x1xf32>
    %129 = arith.mulf %126, %127 : vector<1x32xf32>
    %cst_51 = arith.constant dense<0.000000e+00> : vector<1xf32>
    %130 = vector.multi_reduction <add>, %129, %cst_51 [1] : vector<1x32xf32> to vector<1xf32>
    %131 = vector.shape_cast %130 : vector<1xf32> to vector<1x1xf32>
    %132 = arith.addf %131, %128 : vector<1x1xf32>
    %c0_52 = arith.constant 0 : index
    %c0_53 = arith.constant 0 : index
    %133 = vector.load %arg3[%c0_52, %c0_53] : memref<1x1xf32, #tpu.memory_space<vmem>>, vector<1x1xf32>
    tpu.vector_store %arg3[%c0_52, %c0_53], %132 {strides = array<i32>} : memref<1x1xf32, #tpu.memory_space<vmem>>, vector<1x1xf32>,
    return
  }
}

</mosaic_0001>

<bundles_post_ra>
// kernel: fwd.1
= control target key start
LH: loop header
LB: loop body
LE: loop exit
PB: predicated region body
PF: predicated region fallthrough
CT: control target
= control target key end

     0   :  { %vm22_vm0 = vcmask 64512   ;;  %v863_v2 = vmov 0.0   ;;  %vm864_vm1 = vmmov 0   ;;  %s1079_s0 = inlined_call_operand.vmem [shape: f32[8,16], index: 0, kind: input, shape index: {}]   ;;  %s1080_s1 = inlined_call_operand.vmem [shape: f32[1,8], index: 1, kind: input, shape index: {}]   ;;  %s1081_s2 = inlined_call_operand.vmem [shape: f32[216,64], index: 2, kind: input, shape index: {}]   ;;  %s1082_s3 = inlined_call_operand.hbm [shape: f32[1,1], index: 3, kind: output, shape index: {}]  }
   0x1   :  { %v18_v0 = vld [vmem:[%s1081_s2 + $0x8] sm:$0xff]  ;;  %v21_v1 = vld [vmem:[%s1080_s1] sm:$0x1]  ;;  %755 = vmatprep.subr.mxu0 %v863_v2  ;;  %757 = vmatprep.mubr.msk.f32.mxu0 %vm864_vm1, %v863_v2  ;;  %v20_v3 = vld [vmem:[%s1081_s2 + $0x18] sm:$0xff] }
   0x2   :  { %v15_v4 = vld [vmem:[%s1081_s2] sm:$0xff]  ;;  %756 = vmatpush3.msra.mxu0 %v18_v0  ;;  %778 = vmatprep.subr.mxu1 %v863_v2 }
   0x3   :  { %v16_v5 = vld [vmem:[%s1079_s0] sm:$0xff] }
   0x4   :  { %8 = vsyncpa [#allocation3], 0  ;;  %758 = vmatmul.mubr.msk.f32.vlgmr.msra.gmra.mxu0 %vm22_vm0, %v21_v1  ;;  %760 = vmatprep.subr.mxu0 %v863_v2  ;;  %v19_v6 = vld [vmem:[%s1081_s2 + $0x10] sm:$0xff]  ;;  %v17_v7 = vadd.f32 %v16_v5, %v15_v4  ;;  %vm96_vm2 = vcmask 130048   ;;  %vm172_vm3 = vcmask 253952   ;;  %vm189_vm4 = vcmask 261120  }
   0x5   :  { %761 = vmatpush3.msra.mxu0 %v20_v3  ;;  %764 = vmatprep.mubr.msk.f32.mxu0 %vm864_vm1, %v863_v2  ;;  %s865_s0 = smov 96   ;;  %v203_v30 = vlaneseq  ;;  %v171_v32 = vld [vmem:[%s1081_s2 + $0xc9] sm:$0x1]  ;;  %s866_s25 = smov 32   ;;  %v248_v35 = vld [vmem:[%s1081_s2 + $0x38] sm:$0xff]  ;;  %v247_v36 = vld [vmem:[%s1081_s2 + $0x30] sm:$0xff] }
   0x6   :  { %762 = vmatprep.subr.mxu0 %v863_v2  ;;  %794 = vmatprep.mubr.msk.f32.mxu1 %vm864_vm1, %v863_v2  ;;  %v246_v37 = vld [vmem:[%s1081_s2 + $0x28] sm:$0xff]  ;;  %v245_v38 = vld [vmem:[%s1081_s2 + $0x20] sm:$0xff]  ;;  %v257_v41 = vld [vmem:[%s1081_s2 + $0x78] sm:$0xff]  ;;  %vm336_vm5 = vcmask 523264   ;;  %s867_s27 = smov [#allocation2]   ;;  %vm700_vm6 = vcmask 0  }
   0x7   :  { %763 = vmatpush3.msra.mxu0 %v19_v6  ;;  %v204_v31 = vshrl.u32 %v203_v30, 7  ;;  %v256_v42 = vld [vmem:[%s1081_s2 + $0x70] sm:$0xff]  ;;  %779 = vmatpush3.msra.mxu1 %v257_v41  ;;  %v255_v43 = vld [vmem:[%s1081_s2 + $0x68] sm:$0xff]  ;;  %v254_v45 = vld [vmem:[%s1081_s2 + $0x60] sm:$0xff]  ;;  %s708_s28 = sshll.u32 %s867_s27, 4  ;;  %s709_s28 = int_to_ptr.vmem [resolvable:$true] %s708_s28 }
   0x8   :  { %765 = vmatmul.mubr.msk.f32.vlgmr.msra.gmra.mxu0 %vm96_vm2, %v17_v7  ;;  %767 = vmatprep.subr.mxu0 %v863_v2  ;;  %v170_v44 = vld [vmem:[%s1081_s2 + $0xc8] sm:$0x1]  ;;  %v253_v47 = vld [vmem:[%s1081_s2 + $0x58] sm:$0xff]  ;;  %v252_v48 = vld [vmem:[%s1081_s2 + $0x50] sm:$0xff]  ;;  %s841_s29 = scalar_lea.vmem %s709_s28, 16  ;;  %s845_s30 = scalar_lea.vmem %s709_s28, 32 }
   0x9   :  { %775 = vmatprep.mubr.msk.f32.mxu0 %vm864_vm1, %v863_v2  ;;  %v938_v33 = vsub.s32 0, %v204_v31  ;;  %768 = vmatpush3.msra.mxu0 %v248_v35  ;;  %v251_v49 = vld [vmem:[%s1081_s2 + $0x48] sm:$0xff]  ;;  %v250_v50 = vld [vmem:[%s1081_s2 + $0x40] sm:$0xff]  ;;  %v413_v1 = vld [vmem:[%s1081_s2 + $0xb8] sm:$0xff]  ;;  %p842_p0 = scmp.ne.s32.totalorder %s709_s28, %s841_s29  ;;  %p846_p1 = scmp.lt.s32.totalorder %s709_s28, %s709_s28 }
   0xa   :  { %769 = vmatprep.subr.mxu0 %v863_v2  ;;  %780 = vmatprep.subr.mxu1 %v863_v2  ;;  %p847_p2 = scmp.lt.s32.totalorder %s845_s30, %s841_s29 }
   0xb   :  { %v941_v34 = vrot.slane %v171_v32, %v938_v33  ;;  %770 = vmatpush3.msra.mxu0 %v247_v36  ;;  %781 = vmatpush3.msra.mxu1 %v256_v42  ;;  %v206_v46 = vrot.slane %v170_v44, %v938_v33 }
   0xc   :  { %771 = vmatprep.subr.mxu0 %v863_v2  ;;  %782 = vmatprep.subr.mxu1 %v863_v2  ;;  %p848_p3 = por %p847_p2, %p846_p1 }
   0xd   :  { %772 = vmatpush3.msra.mxu0 %v246_v37  ;;  %783 = vmatpush3.msra.mxu1 %v255_v43 }
   0xe   :  { %773 = vmatprep.subr.mxu0 %v863_v2  ;;  %784 = vmatprep.subr.mxu1 %v863_v2  ;;  %p849_p4 = pnand %p848_p3, %p842_p0 }
   0xf   :  { %774 = vmatpush3.msra.mxu0 %v245_v38  ;;  %785 = vmatpush3.msra.mxu1 %v254_v45 }
  0x10   :  { %797 = vmatprep.subr.mxu0 %v863_v2  ;;  %786 = vmatprep.subr.mxu1 %v863_v2 }
  0x11   :  { %787 = vmatpush3.msra.mxu1 %v253_v47 }
  0x12   :  { %788 = vmatprep.subr.mxu1 %v863_v2 }
  0x13   :  { %789 = vmatpush3.msra.mxu1 %v252_v48  ;;  %v600_v48 = vld [vmem:[%s1081_s2 + $0x98] sm:$0xff] }
  0x14   :  { %790 = vmatprep.subr.mxu1 %v863_v2 }
  0x15   :  { %791 = vmatpush3.msra.mxu1 %v251_v49  ;;  %v599_v49 = vld [vmem:[%s1081_s2 + $0x90] sm:$0xff] }
  0x16   :  { %792 = vmatprep.subr.mxu1 %v863_v2 }
  0x17   :  { %793 = vmatpush3.msra.mxu1 %v250_v50  ;;  %v598_v50 = vld [vmem:[%s1081_s2 + $0x88] sm:$0xff] }
  0x18   :  { %813 = vmatprep.subr.mxu1 %v863_v2 }
  0xc4   :  { %v92_v8 = vpop.f32.mrf.mxu0 }
  0xc5   :  { %v173_v9 = vsel %vm172_vm3, %v92_v8, 0.0 }
  0xc6   :  { %174 = vadd.xlane.f32.xlu1 %v173_v9  ;;  %v759_v10 = vpop.f32.mrf.mxu0 }
  0xc8   :  { %v166_v11 = vpop.f32.mrf.mxu0 }
  0xc9   :  { %214 = vrot.lane.b32.xlu0 %v166_v11, %s865_s0  ;;  %v190_v12 = vsel %vm189_vm4, %v166_v11, 0.0 }
  0xca   :  { %191 = vadd.xlane.f32.xlu1 %v190_v12  ;;  %v766_v13 = vpop.f32.mrf.mxu0 }
  0xcb   :  { %v412_v13 = vld [vmem:[%s1081_s2 + $0xb0] sm:$0xff] }
 0x13b   :  { %v215_v14 = vpop.permute.xlu0 %214 }
 0x13c   :  { %v217_v15 = vsel %vm189_vm4, %v215_v14, 0.0  ;;  %v411_v14 = vld [vmem:[%s1081_s2 + $0xa8] sm:$0xff] }
 0x13d   :  { %218 = vadd.xlane.f32.xlu0 %v217_v15  ;;  %v410_v15 = vld [vmem:[%s1081_s2 + $0xa0] sm:$0xff] }
 0x14f   :  { %v175_v16 = vpop.xlane.xlu1 %174 }
 0x150   :  { %v177_v26 = vmul.f32 0.03125, %v175_v16 }
 0x152   :  { %v178_v27 = vsub.f32 %v92_v8, %v177_v26  ;;  %v414_v26 = vld [vmem:[%s1081_s2 + $0xc0] sm:$0xff] }
 0x153   :  { %v192_v17 = vpop.xlane.xlu1 %191 }
 0x154   :  { %v193_v18 = vmul.f32 0.03125, %v192_v17  ;;  %v179_v28 = vmul.f32 %v178_v27, %v178_v27 }
 0x156   :  { %v924_v19 = vsub.f32 %v166_v11, %v193_v18  ;;  %v180_v29 = vsel %vm172_vm3, %v179_v28, 0.0  ;;  %v249_v18 = vld [vmem:[%s1081_s2 + $0xca] sm:$0x1] }
 0x158   :  { %v195_v20 = vmul.f32 %v924_v19, %v924_v19 }
 0x15a   :  { %v196_v21 = vsel %vm189_vm4, %v195_v20, 0.0  ;;  %v719_v20 = vld [vmem:[%s1081_s2 + $0xcb] ss:$0 sm:$0xff] }
 0x15b   :  { %197 = vadd.xlane.f32.xlu0 %v196_v21 }
 0x1c6   :  { %v219_v22 = vpop.xlane.xlu0 %218 }
 0x1c7   :  { %v220_v23 = vmul.f32 0.03125, %v219_v22 }
 0x1c9   :  { %v929_v24 = vsub.f32 %v166_v11, %v220_v23 }
 0x1cb   :  { %v222_v25 = vmul.f32 %v929_v24, %v929_v24 }
 0x1cd   :  { %224 = vrot.lane.b32.xlu1 %v222_v25, %s865_s0 }
 0x1e4   :  { %v198_v58 = vpop.xlane.xlu0 %197 }
 0x1e5   :  { %v199_v59 = vmul.f32 0.03125, %v198_v58 }
 0x1e7   :  { %v200_v60 = vadd.f32 1e-05, %v199_v59 }
 0x1f1   :  { %181 = vadd.xlane.f32.xlu1 %v180_v29 }
 0x202   :  { %240 = vrot.lane.b32.xlu1 %v941_v34, %s866_s25 }
 0x23f   :  { %v225_v39 = vpop.permute.xlu1 %224 }
 0x240   :  { %v227_v40 = vsel %vm189_vm4, %v225_v39, 0.0 }
 0x241   :  { %228 = vadd.xlane.f32.xlu0 %v227_v40 }
 0x257   :  { %235 = vrot.lane.b32.xlu0 %v206_v46, %s866_s25 }
 0x27a   :  { %v182_v51 = vpop.xlane.xlu1 %181 }
 0x27b   :  { %v183_v52 = vmul.f32 0.03125, %v182_v51  ;;  %v597_v51 = vld [vmem:[%s1081_s2 + $0x80] sm:$0xff] }
 0x27d   :  { %v184_v53 = vadd.f32 1e-05, %v183_v52 }
 0x27e   :  { %v241_v8 = vpop.permute.xlu1 %240 }
 0x27f   :  { %829 = vrsqrt.f32 %v184_v53 }
 0x280   :  { %831 = vrsqrt.f32 %v200_v60 }
 0x28c   :  { %v830_v54 = vpop.eup %829 }
 0x28d   :  { %v186_v55 = vmul.f32 %v830_v54, %v178_v27  ;;  %v832_v0 = vpop.eup %831 }
 0x28e   :  { %v202_v3 = vmul.f32 %v832_v0, %v924_v19 }
 0x28f   :  { %v187_v56 = vmul.f32 %v186_v55, %v170_v44 }
 0x290   :  { %v207_v6 = vmul.f32 %v206_v46, %v202_v3 }
 0x291   :  { %v188_v57 = vadd.f32 %v187_v56, %v171_v32 }
 0x292   :  { %v212_v10 = vadd.f32 %v941_v34, %v207_v6 }
 0x293   :  { %776 = vmatmul.mubr.msk.f32.vlgmr.msra.gmra.mxu0 %vm189_vm4, %v188_v57 }
 0x294   :  { %805 = vmatprep.mubr.msk.f32.mxu0 %vm864_vm1, %v863_v2  ;;  %798 = vmatpush3.msra.mxu0 %v413_v1 }
 0x295   :  { %799 = vmatprep.subr.mxu0 %v863_v2 }
 0x296   :  { %800 = vmatpush3.msra.mxu0 %v412_v13  ;;  %v675_v13 = vld [vmem:[%s1081_s2 + $0xcd] sm:$0x1] }
 0x297   :  { %801 = vmatprep.subr.mxu0 %v863_v2 }
 0x298   :  { %802 = vmatpush3.msra.mxu0 %v411_v14 }
 0x299   :  { %803 = vmatprep.subr.mxu0 %v863_v2 }
 0x29a   :  { %804 = vmatpush3.msra.mxu0 %v410_v15  ;;  %v676_v15 = vld [vmem:[%s1081_s2 + $0xce] sm:$0x1] }
 0x29b   :  { %808 = vmatprep.subr.mxu0 %v863_v2 }
 0x2ca   :  { %v229_v61 = vpop.xlane.xlu0 %228 }
 0x2cb   :  { %v230_v62 = vmul.f32 0.03125, %v229_v61 }
 0x2cd   :  { %v231_v63 = vadd.f32 1e-05, %v230_v62 }
 0x2ce   :  { %v236_v5 = vpop.permute.xlu0 %235 }
 0x2cf   :  { %833 = vrsqrt.f32 %v231_v63 }
 0x2dc   :  { %v834_v4 = vpop.eup %833 }
 0x2dd   :  { %v233_v7 = vmul.f32 %v834_v4, %v929_v24 }
 0x2df   :  { %v238_v9 = vmul.f32 %v236_v5, %v233_v7 }
 0x2e1   :  { %v243_v11 = vadd.f32 %v241_v8, %v238_v9 }
 0x2e3   :  { %v244_v12 = vsel %vm189_vm4, %v212_v10, %v243_v11 }
 0x2e4   :  { %795 = vmatmul.mubr.msk.f32.vlgmr.msra.gmra.mxu1 %vm336_vm5, %v244_v12 }
 0x2e5   :  { %821 = vmatprep.mubr.msk.f32.mxu1 %vm864_vm1, %v863_v2  ;;  %814 = vmatpush3.msra.mxu1 %v600_v48 }
 0x2e6   :  { %815 = vmatprep.subr.mxu1 %v863_v2 }
 0x2e7   :  { %816 = vmatpush3.msra.mxu1 %v599_v49 }
 0x2e8   :  { %817 = vmatprep.subr.mxu1 %v863_v2 }
 0x2e9   :  { %818 = vmatpush3.msra.mxu1 %v598_v50 }
 0x2ea   :  { %819 = vmatprep.subr.mxu1 %v863_v2 }
 0x2eb   :  { %820 = vmatpush3.msra.mxu1 %v597_v51 }
 0x353   :  { %v328_v16 = vpop.f32.mrf.mxu0 }
 0x354   :  { %v329_v19 = vadd.f32 %v328_v16, %v249_v18  ;;  %v693_v18 = vld [vmem:[%s1081_s2 + $0xcf] sm:$0x1] }
 0x355   :  { %v777_v17 = vpop.f32.mrf.mxu0 }
 0x356   :  { %v418_v22 = vrot.slane %v329_v19, %v938_v33 }
 0x3a4   :  { %v406_v21 = vpop.f32.mrf.mxu1 }
 0x3a5   :  { %v407_v23 = vadd.f32 %v719_v20, %v406_v21 }
 0x3a6   :  { %v796_v24 = vpop.f32.mrf.mxu1 }
 0x3a7   :  { %v419_v25 = vmul.f32 %v418_v22, %v407_v23  ;;  %586 = vrot.lane.b32.xlu0 %v407_v23, %s865_s0  ;;  %v694_v22 = vld [vmem:[%s1081_s2 + $0xd0] sm:$0x1] }
 0x3a9   :  { %806 = vmatmul.mubr.msk.f32.vlgmr.msra.gmra.mxu0 %vm189_vm4, %v419_v25 }
 0x3aa   :  { %810 = vmatprep.mubr.msk.f32.mxu0 %vm864_vm1, %v863_v2  ;;  %809 = vmatpush3.msra.mxu0 %v414_v26  ;;  %v601_v2 = vld [vmem:[%s1081_s2 + $0xcc] sm:$0x1] }
 0x419   :  { %v587_v52 = vpop.permute.xlu0 %586 }
 0x469   :  { %v489_v27 = vpop.f32.mrf.mxu0 }
 0x46a   :  { %v493_v28 = vsel %vm22_vm0, %v489_v27, -inf }
 0x46b   :  { %v494_v29 = vrot.slane %v493_v28, 4  ;;  %v807_v30 = vpop.f32.mrf.mxu0 }
 0x46d   :  { %v495_v31 = vmax.f32 %v493_v28, %v494_v29 }
 0x46f   :  { %v496_v32 = vrot.slane %v495_v31, 2 }
 0x471   :  { %v497_v33 = vmax.f32 %v495_v31, %v496_v32 }
 0x473   :  { %v498_v34 = vrot.slane %v497_v33, 1 }
 0x475   :  { %v499_v35 = vmax.f32 %v497_v33, %v498_v34 }
 0x477   :  { %v500_v36 = vsub.f32 %v489_v27, %v499_v35 }
 0x479   :  { %v501_v37 = vmul.f32 1.442695, %v500_v36 }
 0x47b   :  { %835 = vpow2.f32 %v501_v37 }
 0x488   :  { %v836_v38 = vpop.eup %835 }
 0x489   :  { %v503_v39 = vsel %vm22_vm0, %v836_v38, 0.0 }
 0x48a   :  { %v504_v40 = vrot.slane %v503_v39, 4 }
 0x48c   :  { %v505_v41 = vadd.f32 %v504_v40, %v503_v39 }
 0x48e   :  { %v506_v42 = vrot.slane %v505_v41, 2 }
 0x490   :  { %v507_v43 = vadd.f32 %v506_v42, %v505_v41 }
 0x492   :  { %v508_v44 = vrot.slane %v507_v43, 1 }
 0x494   :  { %v509_v45 = vadd.f32 %v508_v44, %v507_v43 }
 0x496   :  { %837 = vrcp.f32 %v509_v45 }
 0x4a3   :  { %v838_v46 = vpop.eup %837 }
 0x4a4   :  { %v511_v47 = vmul.f32 %v838_v46, %v836_v38 }
 0x4a6   :  { %811 = vmatmul.mubr.msk.f32.vlgmr.msra.gmra.mxu0 %vm22_vm0, %v511_v47 }
 0x566   :  { %v581_v53 = vpop.f32.mrf.mxu0 }
 0x567   :  { %v589_v54 = vmul.f32 %v587_v52, %v581_v53 }
 0x568   :  { %v812_v55 = vpop.f32.mrf.mxu0 }
 0x569   :  { %v590_v56 = vsel %vm189_vm4, %v589_v54, 0.0 }
 0x56a   :  { %v591_v57 = vrot.slane %v590_v56, 4 }
 0x56c   :  { %v592_v58 = vadd.f32 %v591_v57, %v590_v56 }
 0x56e   :  { %v593_v59 = vrot.slane %v592_v58, 2 }
 0x570   :  { %v594_v60 = vadd.f32 %v593_v59, %v592_v58 }
 0x572   :  { %v595_v61 = vrot.slane %v594_v60, 1 }
 0x574   :  { %v596_v62 = vadd.f32 %v595_v61, %v594_v60 }
 0x576   :  { %822 = vmatmul.mubr.msk.f32.vlgmr.msra.gmra.mxu1 %vm189_vm4, %v596_v62 }
 0x636   :  { %v671_v63 = vpop.f32.mrf.mxu1 }
 0x637   :  { %v672_v0 = vadd.f32 %v671_v63, %v601_v2 }
 0x638   :  { %v823_v1 = vpop.f32.mrf.mxu1 }
 0x639   :  { %v677_v3 = vsel %vm172_vm3, %v672_v0, 0.0 }
 0x63a   :  { %678 = vadd.xlane.f32.xlu0 %v677_v3 }
 0x6c3   :  { %v679_v4 = vpop.xlane.xlu0 %678 }
 0x6c4   :  { %v680_v5 = vmul.f32 0.03125, %v679_v4 }
 0x6c6   :  { %v681_v6 = vsub.f32 %v672_v0, %v680_v5 }
 0x6c8   :  { %v682_v7 = vmul.f32 %v681_v6, %v681_v6 }
 0x6ca   :  { %v683_v8 = vsel %vm172_vm3, %v682_v7, 0.0 }
 0x6cb   :  { %684 = vadd.xlane.f32.xlu1 %v683_v8 }
 0x754   :  { %v685_v9 = vpop.xlane.xlu1 %684 }
 0x755   :  { %v686_v10 = vmul.f32 0.03125, %v685_v9 }
 0x757   :  { %v687_v11 = vadd.f32 1e-05, %v686_v10 }
 0x759   :  { %839 = vrsqrt.f32 %v687_v11 }
 0x766   :  { %v840_v12 = vpop.eup %839 }
 0x767   :  { %v689_v14 = vmul.f32 %v840_v12, %v681_v6 }
 0x769   :  { %v690_v16 = vmul.f32 %v689_v14, %v675_v13 }
 0x76b   :  { %v691_v17 = vadd.f32 %v690_v16, %v676_v15 }
 0x76d   :  { %v692_v19 = vmax.f32 %v691_v17, 0.0 }
 0x76f   :  { %v695_v20 = vmul.f32 %v693_v18, %v692_v19 }
 0x771   :  { %v696_v21 = vsel %vm172_vm3, %v695_v20, 0.0 }
 0x772   :  { %697 = vadd.xlane.f32.xlu0 %v696_v21 }
 0x7fb   :  { %v698_v23 = vpop.xlane.xlu0 %697 }
 0x7fc   :  { %v699_v24 = vadd.f32 %v698_v23, %v694_v22 }
 0x7fe   :  { %701 = vst.msk [vmem:[#allocation2] sm:$0x1] %vm700_vm6, %v699_v24 }
 0x7ff   :  { %852 = shalt.err (!%p849_p4)
}
 0x800   :  { %711 = dma.vmem_to_hbm [thread:$0]  %s709_s28, 16, %s1082_s3, [#allocation3]  }
 0x801   :  { %861 = dma.done.wait [#allocation3], 16  }
 0x802   :  { %862 = vsyncadd [#allocation3], 4294967280 }
 0x803   :  { %715 = vsyncpa [#allocation3], 1 }

</bundles_post_ra>
